<compile_context>
chip_gen: v6e
topology: v6e:2x2x1
jax: 0.10.0
libtpu: 0.0.40
codegen_flags: <defaults>
</compile_context>

<pallas_src>
import functools

import jax
import jax.numpy as jnp
from jax.experimental import pallas as pl
from jax.experimental.pallas import tpu as pltpu


def _round_up(x, m):
    return (x + m - 1) // m * m


def _choose_pack(z_dim):
    # Smallest packing factor making each output row a multiple of 128 lanes
    # (unmasked stores).  Falls back to 1 (still correct, just masked stores).
    for p in (1, 2, 4, 8):
        if (p * z_dim) % 128 == 0:
            return p
    return 1


def _layout_params(u_dim, z_dim):
    pack = _choose_pack(z_dim)
    half = _round_up(max(u_dim, 1), 32)   # one-hot sub-block per packed sample
    k_pad = pack * half                   # contraction width (128 for z_dim=32, u_dim<=32)
    return pack, half, k_pad


def build_zprior_tables(embed_mean, embed_log_var):
    """Block-diagonal gather tables. Precompute once per parameter update and
    pass via `tables=` to keep the per-call path free of table construction."""
    u_dim, z_dim = embed_mean.shape
    pack, half, k_pad = _layout_params(u_dim, z_dim)
    compute_dtype = jnp.bfloat16 if embed_mean.dtype == jnp.bfloat16 else jnp.float32

    def block_diag(tab):
        t = jnp.zeros((k_pad, pack * z_dim), compute_dtype)
        tab_c = tab.astype(compute_dtype)
        for p in range(pack):  # static, tiny
            t = t.at[p * half:p * half + u_dim,
                     p * z_dim:(p + 1) * z_dim].set(tab_c)
        return t

    return block_diag(embed_mean), block_diag(embed_log_var)


def _zprior_kernel(u_ref, tmean_ref, tlv_ref, omean_ref, olv_ref, *,
                   u_dim, half, compute_dtype):
    """One tile: gather `pack` samples per packed row via one one-hot MXU matmul
    against each (mean / log_var) block-diagonal table.

    u_ref:     (TM, PACK) int32 class ids.
    t*_ref:    (K_PAD, PACK*z_dim) block-diagonal tables (VMEM-resident).
    o*_ref:    (TM, PACK*z_dim) outputs in the embedding dtype.
    """
    u = jnp.clip(u_ref[...], 0, u_dim - 1)            # (TM, PACK) int32
    tm, pack = u.shape
    k_pad = tmean_ref.shape[0]

    # Lane-dense one-hot: one compare per packed position, OR'd together
    # (positions live in disjoint K sub-blocks), cast once for the matmul.
    iota = jax.lax.broadcasted_iota(jnp.int32, (tm, k_pad), 1)
    oh = iota == u[:, 0:1]
    for p in range(1, pack):                           # static unroll
        oh = jnp.logical_or(oh, iota == (u[:, p:p + 1] + p * half))
    oh = oh.astype(jnp.float32)
    if compute_dtype != jnp.float32:
        oh = oh.astype(compute_dtype)                  # exact (0/1) in bf16

    # Disjoint column blocks make each matmul an exact row copy of the table.
    omean_ref[...] = jnp.dot(
        oh, tmean_ref[...], preferred_element_type=jnp.float32
    ).astype(omean_ref.dtype)
    olv_ref[...] = jnp.dot(
        oh, tlv_ref[...], preferred_element_type=jnp.float32
    ).astype(olv_ref.dtype)


def zprior_discrete_forward(u, embed_mean, embed_log_var, *, tables=None,
                            tm_rows=2048, min_pallas_elems=4096):
    """Pallas equivalent of ZPriorDiscrete.forward.

    u:              int tensor of class ids in [0, u_dim), any shape.
    embed_mean:     (u_dim, z_dim) embedding table.
    embed_log_var:  (u_dim, z_dim) embedding table.
    Returns (lam_mean, lam_log_var), each u.shape + (z_dim,) in the table dtype.
    """
    u_dim, z_dim = embed_mean.shape
    assert embed_log_var.shape == (u_dim, z_dim)
    out_dtype = embed_mean.dtype
    orig_shape = u.shape
    u_flat = u.reshape(-1).astype(jnp.int32)
    n = u_flat.shape[0]

    # Small problems: the pad + pallas_call + trim chain costs more than a
    # fused XLA gather; use jnp.take.
    if n < min_pallas_elems:
        u_safe = jnp.clip(u_flat, 0, u_dim - 1)
        lam_mean = jnp.take(embed_mean, u_safe, axis=0).reshape(*orig_shape, z_dim)
        lam_log_var = jnp.take(embed_log_var, u_safe, axis=0).reshape(*orig_shape, z_dim)
        return lam_mean, lam_log_var

    pack, half, k_pad = _layout_params(u_dim, z_dim)
    compute_dtype = jnp.bfloat16 if out_dtype == jnp.bfloat16 else jnp.float32
    if tables is None:
        tables = build_zprior_tables(embed_mean, embed_log_var)
    table_mean, table_log_var = tables
    out_w = pack * z_dim

    # Row tiling: biggest tile up to tm_rows (per-grid-step overhead ~0.35us);
    # no artificial halving -- for large n the grid is naturally >= 2 steps so
    # megacore sharding still happens.  Padded ids are 0 (valid) and trimmed.
    n_rows = pl.cdiv(max(n, 1), pack)
    tile = min(tm_rows, _round_up(n_rows, 8))
    n_rows_pad = _round_up(n_rows, tile)

    u_pad = jnp.zeros((n_rows_pad * pack,), jnp.int32).at[:n].set(u_flat)
    u_packed = u_pad.reshape(n_rows_pad, pack)

    grid = (n_rows_pad // tile,)

    out_isz = jnp.dtype(out_dtype).itemsize
    tab_isz = jnp.dtype(compute_dtype).itemsize
    cost = pl.CostEstimate(
        flops=2 * 2 * n_rows_pad * k_pad * out_w,
        transcendentals=0,
        bytes_accessed=(n_rows_pad * pack * 4
                        + 2 * k_pad * out_w * tab_isz
                        + 2 * n_rows_pad * out_w * out_isz),
    )

    kernel = functools.partial(_zprior_kernel, u_dim=u_dim, half=half,
                               compute_dtype=compute_dtype)

    out_mean, out_log_var = pl.pallas_call(
        kernel,
        out_shape=(jax.ShapeDtypeStruct((n_rows_pad, out_w), out_dtype),
                   jax.ShapeDtypeStruct((n_rows_pad, out_w), out_dtype)),
        grid_spec=pltpu.PrefetchScalarGridSpec(
            num_scalar_prefetch=0,
            grid=grid,
            in_specs=[
                pl.BlockSpec((tile, pack), lambda i: (i, 0)),       # packed ids
                pl.BlockSpec((k_pad, out_w), lambda i: (0, 0)),     # mean table (resident)
                pl.BlockSpec((k_pad, out_w), lambda i: (0, 0)),     # log_var table (resident)
            ],
            out_specs=[
                pl.BlockSpec((tile, out_w), lambda i: (i, 0)),      # lam_mean rows
                pl.BlockSpec((tile, out_w), lambda i: (i, 0)),      # lam_log_var rows
            ],
        ),
        compiler_params=pltpu.CompilerParams(
            dimension_semantics=("parallel",),
            vmem_limit_bytes=32 * 1024 * 1024,
        ),
        cost_estimate=cost,
    )(u_packed, table_mean, table_log_var)

    # Contiguous (free) un-pack: (n_rows_pad, pack*z) -> (n, z) -> orig shape.
    lam_mean = out_mean.reshape(n_rows_pad * pack, z_dim)[:n].reshape(*orig_shape, z_dim)
    lam_log_var = out_log_var.reshape(n_rows_pad * pack, z_dim)[:n].reshape(*orig_shape, z_dim)
    return lam_mean, lam_log_var


if __name__ == "__main__":
    # Small shapes consistent with the module usage: u_dim condition classes,
    # z_dim=32 latent, 2 trials x 140 timesteps of class ids (not tile-aligned,
    # to exercise the padding/trim path).
    u_dim, z_dim = 5, 32
    trials, timesteps = 2, 140

    key = jax.random.PRNGKey(0)
    k_mean, k_lv, k_u = jax.random.split(key, 3)

    # nn.Embedding default init: N(0, 1).  Values snapped to bf16-representable
    # f32 so the exactness check below is independent of the MXU f32 pass count.
    embed_mean = jax.random.normal(k_mean, (u_dim, z_dim), jnp.float32)
    embed_mean = embed_mean.astype(jnp.bfloat16).astype(jnp.float32)
    embed_log_var = jax.random.normal(k_lv, (u_dim, z_dim), jnp.float32)
    embed_log_var = embed_log_var.astype(jnp.bfloat16).astype(jnp.float32)

    u = jax.random.randint(k_u, (trials, timesteps), 0, u_dim, dtype=jnp.int32)

    # Force the Pallas path for this small smoke test (production default falls
    # back to jnp.take below ~4096 elements).
    fwd = jax.jit(functools.partial(zprior_discrete_forward, min_pallas_elems=0))
    lam_mean, lam_log_var = fwd(u, embed_mean, embed_log_var)
    jax.block_until_ready((lam_mean, lam_log_var))

    # Reference check (plain JAX embedding lookup).
    ref_mean = jnp.take(embed_mean, u, axis=0)
    ref_log_var = jnp.take(embed_log_var, u, axis=0)
    assert lam_mean.shape == (trials, timesteps, z_dim)
    assert lam_log_var.shape == (trials, timesteps, z_dim)
    assert lam_mean.dtype == embed_mean.dtype
    assert jnp.allclose(lam_mean, ref_mean, atol=1e-6)
    assert jnp.allclose(lam_log_var, ref_log_var, atol=1e-6)

    print("KERNEL_OK")
</pallas_src>

<mosaic_0001>
module attributes {stable_mosaic.version = 11 : i64} {
  func.func @_zprior_kernel(%arg0: i32, %arg1: memref<72x4xi32, #tpu.memory_space<vmem>>, %arg2: memref<128x128xf32, #tpu.memory_space<vmem>>, %arg3: memref<128x128xf32, #tpu.memory_space<vmem>>, %arg4: memref<72x128xf32, #tpu.memory_space<vmem>>, %arg5: memref<72x128xf32, #tpu.memory_space<vmem>>) attributes {dimension_semantics = [#tpu.dimension_semantics<parallel>], iteration_bounds = array<i64: 1>, scalar_prefetch = 0 : i64, scratch_operands = 0 : i64, tpu.core_type = #tpu.core_type<tc>, window_params = [{transform_indices = @transform_0, window_bounds = array<i64: 72, 4>}, {pipeline_mode = #tpu.pipeline_mode<synchronous>, transform_indices = @transform_1, window_bounds = array<i64: 128, 128>}, {pipeline_mode = #tpu.pipeline_mode<synchronous>, transform_indices = @transform_2, window_bounds = array<i64: 128, 128>}, {transform_indices = @transform_3, window_bounds = array<i64: 72, 128>}, {transform_indices = @transform_4, window_bounds = array<i64: 72, 128>}]} {
    %c0 = arith.constant 0 : index
    %c0_0 = arith.constant 0 : index
    %0 = vector.load %arg1[%c0, %c0_0] : memref<72x4xi32, #tpu.memory_space<vmem>>, vector<72x4xi32>
    %c0_i32 = arith.constant 0 : i32
    %c4_i32 = arith.constant 4 : i32
    %1 = vector.broadcast %c0_i32 : i32 to vector<72x4xi32>
    %2 = arith.maxsi %1, %0 : vector<72x4xi32>
    %3 = vector.broadcast %c4_i32 : i32 to vector<72x4xi32>
    %4 = arith.minsi %3, %2 : vector<72x4xi32>
    %5 = tpu.iota {dimensions = array<i32: 1>} : vector<72x128xi32>
    %6 = vector.extract_strided_slice %4 {offsets = [0, 0], sizes = [72, 1], strides = [1, 1]} : vector<72x4xi32> to vector<72x1xi32>
    %7 = vector.broadcast %6 : vector<72x1xi32> to vector<72x128xi32>
    %8 = arith.cmpi eq, %5, %7 : vector<72x128xi32>
    %9 = vector.extract_strided_slice %4 {offsets = [0, 1], sizes = [72, 1], strides = [1, 1]} : vector<72x4xi32> to vector<72x1xi32>
    %c32_i32 = arith.constant 32 : i32
    %10 = vector.broadcast %c32_i32 : i32 to vector<72x1xi32>
    %11 = arith.addi %9, %10 : vector<72x1xi32>
    %12 = vector.broadcast %11 : vector<72x1xi32> to vector<72x128xi32>
    %13 = arith.cmpi eq, %5, %12 : vector<72x128xi32>
    %14 = arith.ori %8, %13 : vector<72x128xi1>
    %15 = vector.extract_strided_slice %4 {offsets = [0, 2], sizes = [72, 1], strides = [1, 1]} : vector<72x4xi32> to vector<72x1xi32>
    %c64_i32 = arith.constant 64 : i32
    %16 = vector.broadcast %c64_i32 : i32 to vector<72x1xi32>
    %17 = arith.addi %15, %16 : vector<72x1xi32>
    %18 = vector.broadcast %17 : vector<72x1xi32> to vector<72x128xi32>
    %19 = arith.cmpi eq, %5, %18 : vector<72x128xi32>
    %20 = arith.ori %14, %19 : vector<72x128xi1>
    %21 = vector.extract_strided_slice %4 {offsets = [0, 3], sizes = [72, 1], strides = [1, 1]} : vector<72x4xi32> to vector<72x1xi32>
    %c96_i32 = arith.constant 96 : i32
    %22 = vector.broadcast %c96_i32 : i32 to vector<72x1xi32>
    %23 = arith.addi %21, %22 : vector<72x1xi32>
    %24 = vector.broadcast %23 : vector<72x1xi32> to vector<72x128xi32>
    %25 = arith.cmpi eq, %5, %24 : vector<72x128xi32>
    %26 = arith.ori %20, %25 : vector<72x128xi1>
    %27 = arith.extui %26 : vector<72x128xi1> to vector<72x128xi32>
    %28 = arith.sitofp %27 : vector<72x128xi32> to vector<72x128xf32>
    %c0_1 = arith.constant 0 : index
    %c0_2 = arith.constant 0 : index
    %29 = vector.load %arg2[%c0_1, %c0_2] : memref<128x128xf32, #tpu.memory_space<vmem>>, vector<128x128xf32>
    %cst = arith.constant dense<0.000000e+00> : vector<72x128xf32>
    %30 = tpu.matmul %28, %29, %cst {dimension_numbers = #tpu.dot_dimension_numbers<[1], [0], [0], [1], [0, 0, 1, 1], [], []>} : vector<72x128xf32>, vector<128x128xf32>, vector<72x128xf32> -> vector<72x128xf32>
    %c0_3 = arith.constant 0 : index
    %c0_4 = arith.constant 0 : index
    %31 = vector.load %arg4[%c0_3, %c0_4] : memref<72x128xf32, #tpu.memory_space<vmem>>, vector<72x128xf32>
    tpu.vector_store %arg4[%c0_3, %c0_4], %30 {strides = array<i32>} : memref<72x128xf32, #tpu.memory_space<vmem>>, vector<72x128xf32>,
    %c0_5 = arith.constant 0 : index
    %c0_6 = arith.constant 0 : index
    %32 = vector.load %arg3[%c0_5, %c0_6] : memref<128x128xf32, #tpu.memory_space<vmem>>, vector<128x128xf32>
    %cst_7 = arith.constant dense<0.000000e+00> : vector<72x128xf32>
    %33 = tpu.matmul %28, %32, %cst_7 {dimension_numbers = #tpu.dot_dimension_numbers<[1], [0], [0], [1], [0, 0, 1, 1], [], []>} : vector<72x128xf32>, vector<128x128xf32>, vector<72x128xf32> -> vector<72x128xf32>
    %c0_8 = arith.constant 0 : index
    %c0_9 = arith.constant 0 : index
    %34 = vector.load %arg5[%c0_8, %c0_9] : memref<72x128xf32, #tpu.memory_space<vmem>>, vector<72x128xf32>
    tpu.vector_store %arg5[%c0_8, %c0_9], %33 {strides = array<i32>} : memref<72x128xf32, #tpu.memory_space<vmem>>, vector<72x128xf32>,
    return
  }
  func.func @transform_0(%arg0: i32) -> (i32, i32) {
    %c0_i32 = arith.constant 0 : i32
    %c0_i32_0 = arith.constant 0 : i32
    return %arg0, %c0_i32 : i32, i32
  }
  func.func @transform_1(%arg0: i32) -> (i32, i32) {
    %c0_i32 = arith.constant 0 : i32
    %c0_i32_0 = arith.constant 0 : i32
    %c0_i32_1 = arith.constant 0 : i32
    return %c0_i32, %c0_i32_0 : i32, i32
  }
  func.func @transform_2(%arg0: i32) -> (i32, i32) {
    %c0_i32 = arith.constant 0 : i32
    %c0_i32_0 = arith.constant 0 : i32
    %c0_i32_1 = arith.constant 0 : i32
    return %c0_i32, %c0_i32_0 : i32, i32
  }
  func.func @transform_3(%arg0: i32) -> (i32, i32) {
    %c0_i32 = arith.constant 0 : i32
    %c0_i32_0 = arith.constant 0 : i32
    return %arg0, %c0_i32 : i32, i32
  }
  func.func @transform_4(%arg0: i32) -> (i32, i32) {
    %c0_i32 = arith.constant 0 : i32
    %c0_i32_0 = arith.constant 0 : i32
    return %arg0, %c0_i32 : i32, i32
  }
}

</mosaic_0001>

<bundles_post_ra>
// kernel: zprior_discrete_forward.1
= control target key start
LH: loop header
LB: loop body
LE: loop exit
PB: predicated region body
PF: predicated region fallthrough
CT: control target
= control target key end

     0   :  { %v790_v0 = vmov 0   ;;  %v791_v5 = vmov 0.0   ;;  %v792_v21 = vmov 2   ;;  %v793_v22 = vmov 3   ;;  %s1196_s0 = inlined_call_operand.vmem [shape: s32[72,4], index: 0, kind: input, shape index: {}]   ;;  %s1197_s1 = inlined_call_operand.vmem [shape: f32[128,128], index: 1, kind: input, shape index: {}]   ;;  %s1198_s2 = inlined_call_operand.vmem [shape: f32[128,128], index: 2, kind: input, shape index: {}]   ;;  %s1199_s3 = inlined_call_operand.vmem [shape: f32[72,128], index: 3, kind: output, shape index: {0}]   ;;  %s1200_s4 = inlined_call_operand.vmem [shape: f32[72,128], index: 4, kind: output, shape index: {1}]  }
   0x1   :  { %760 = vset.pattern.permute.xlu1 %v790_v0  ;;  %759 = vset.pattern.permute.xlu0 %v790_v0  ;;  %v17_v1 = vld [vmem:[%s1196_s0 + $0x8] sm:$0xff]  ;;  %v16_v2 = vld [vmem:[%s1196_s0] sm:$0xff]  ;;  %v18_v4 = vld [vmem:[%s1196_s0 + $0x10] sm:$0xff]  ;;  %v794_v47 = vmov 1  }
   0x2   :  { %v20_v3 = vld [vmem:[%s1196_s0 + $0x20] sm:$0xff]  ;;  %vm27_vm0 = vcmp.gt.s32.totalorder %v17_v1, 0  ;;  %vm25_vm1 = vcmp.gt.s32.totalorder %v16_v2, 0  ;;  %634 = vmatprep.subr.mxu0 %v791_v5  ;;  %693 = vmatprep.subr.mxu1 %v791_v5  ;;  %vm29_vm5 = vcmp.gt.s32.totalorder %v18_v4, 0  ;;  %v294_v9 = vld [vmem:[%s1197_s1 + $0x78] sm:$0xff]  ;;  %v21_v12 = vld [vmem:[%s1196_s0 + $0x28] sm:$0xff] }
   0x3   :  { %vm33_vm2 = vcmp.gt.s32.totalorder %v20_v3, 0  ;;  %v28_v6 = vsel %vm27_vm0, %v17_v1, 0  ;;  %v26_v7 = vsel %vm25_vm1, %v16_v2, 0  ;;  %635 = vmatpush3.msra.mxu0 %v294_v9  ;;  %v429_v13 = vld [vmem:[%s1198_s2 + $0x78] sm:$0xff]  ;;  %v293_v14 = vld [vmem:[%s1197_s1 + $0x70] sm:$0xff]  ;;  %v30_v18 = vsel %vm29_vm5, %v18_v4, 0 }
   0x4   :  { %v34_v8 = vsel %vm33_vm2, %v20_v3, 0  ;;  %vm45_vm3 = vcmp.lt.s32.totalorder %v28_v6, 4  ;;  %vm43_vm4 = vcmp.lt.s32.totalorder %v26_v7, 4  ;;  %v428_v15 = vld [vmem:[%s1198_s2 + $0x70] sm:$0xff]  ;;  %694 = vmatpush3.msra.mxu1 %v429_v13  ;;  %636 = vmatprep.subr.mxu0 %v791_v5  ;;  %vm35_vm7 = vcmp.gt.s32.totalorder %v21_v12, 0  ;;  %v292_v20 = vld [vmem:[%s1197_s1 + $0x68] sm:$0xff] }
   0x5   :  { %v841_v10 = vsel %vm45_vm3, %v28_v6, 4  ;;  %v843_v11 = vsel %vm43_vm4, %v26_v7, 4  ;;  %vm51_vm6 = vcmp.lt.s32.totalorder %v34_v8, 4  ;;  %695 = vmatprep.subr.mxu1 %v791_v5  ;;  %637 = vmatpush3.msra.mxu0 %v293_v14  ;;  %vm47_vm8 = vcmp.lt.s32.totalorder %v30_v18, 4  ;;  %v427_v23 = vld [vmem:[%s1198_s2 + $0x68] sm:$0xff]  ;;  %v291_v26 = vld [vmem:[%s1197_s1 + $0x60] sm:$0xff] }
   0x6   :  { %67 = vperm.xlu1 %760, %v841_v10   ;;  %64 = vperm.xlu0 %759, %v843_v11   ;;  %v208_v16 = vadd.s32 96, %v841_v10  ;;  %v153_v17 = vadd.s32 64, %v843_v11  ;;  %v862_v19 = vsel %vm51_vm6, %v34_v8, 4  ;;  %v36_v25 = vsel %vm35_vm7, %v21_v12, 0  ;;  %v426_v29 = vld [vmem:[%s1198_s2 + $0x60] sm:$0xff]  ;;  %v290_v30 = vld [vmem:[%s1197_s1 + $0x58] sm:$0xff] }
   0x7   :  { %696 = vmatpush3.msra.mxu1 %v428_v15  ;;  %638 = vmatprep.subr.mxu0 %v791_v5  ;;  %v211_v24 = vadd.s32 96, %v862_v19  ;;  %v207_v27 = vadd.s32 96, %v843_v11  ;;  %v880_v28 = vsel %vm47_vm8, %v30_v18, 4  ;;  %vm53_vm9 = vcmp.lt.s32.totalorder %v36_v25, 4  ;;  %v425_v31 = vld [vmem:[%s1198_s2 + $0x58] sm:$0xff]  ;;  %v289_v36 = vld [vmem:[%s1197_s1 + $0x50] sm:$0xff] }
   0x8   :  { %697 = vmatprep.subr.mxu1 %v791_v5  ;;  %639 = vmatpush3.msra.mxu0 %v292_v20  ;;  %v155_v32 = vadd.s32 64, %v880_v28  ;;  %v154_v33 = vadd.s32 64, %v841_v10  ;;  %v896_v34 = vsel %vm53_vm9, %v36_v25, 4  ;;  %v19_v35 = vld [vmem:[%s1196_s0 + $0x18] sm:$0xff]  ;;  %v424_v37 = vld [vmem:[%s1198_s2 + $0x50] sm:$0xff]  ;;  %v288_v39 = vld [vmem:[%s1197_s1 + $0x48] sm:$0xff] }
   0x9   :  { %698 = vmatpush3.msra.mxu1 %v427_v23  ;;  %640 = vmatprep.subr.mxu0 %v791_v5  ;;  %v158_v38 = vadd.s32 64, %v896_v34  ;;  %vm31_vm10 = vcmp.gt.s32.totalorder %v19_v35, 0  ;;  %v22_v40 = vld [vmem:[%s1196_s0 + $0x30] sm:$0xff]  ;;  %v423_v41 = vld [vmem:[%s1198_s2 + $0x48] sm:$0xff]  ;;  %v287_v43 = vld [vmem:[%s1197_s1 + $0x40] sm:$0xff]  ;;  %v99_v44 = vadd.s32 32, %v843_v11 }
   0xa   :  { %761 = vset.pattern.permute.xlu1 %v792_v21  ;;  %765 = vset.pattern.permute.xlu0 %v793_v22  ;;  %v32_v42 = vsel %vm31_vm10, %v19_v35, 0  ;;  %vm37_vm11 = vcmp.gt.s32.totalorder %v22_v40, 0  ;;  %v422_v45 = vld [vmem:[%s1198_s2 + $0x40] sm:$0xff]  ;;  %v101_v46 = vadd.s32 32, %v880_v28  ;;  %v286_v49 = vld [vmem:[%s1197_s1 + $0x38] sm:$0xff]  ;;  %v100_v50 = vadd.s32 32, %v841_v10 }
   0xb   :  { %220 = vperm.xlu0 %765, %v208_v16   ;;  %163 = vperm.xlu1 %761, %v153_v17   ;;  %vm49_vm12 = vcmp.lt.s32.totalorder %v32_v42, 4  ;;  %v38_v48 = vsel %vm37_vm11, %v22_v40, 0  ;;  %v421_v51 = vld [vmem:[%s1198_s2 + $0x38] sm:$0xff]  ;;  %v285_v53 = vld [vmem:[%s1197_s1 + $0x30] sm:$0xff]  ;;  %v209_v55 = vadd.s32 96, %v880_v28  ;;  %v284_v58 = vld [vmem:[%s1197_s1 + $0x28] sm:$0xff] }
   0xc   :  { %699 = vmatprep.subr.mxu1 %v791_v5  ;;  %641 = vmatpush3.msra.mxu0 %v291_v26  ;;  %v50_v52 = vsel %vm49_vm12, %v32_v42, 4  ;;  %vm55_vm13 = vcmp.lt.s32.totalorder %v38_v48, 4  ;;  %v420_v54 = vld [vmem:[%s1198_s2 + $0x30] sm:$0xff]  ;;  %v419_v59 = vld [vmem:[%s1198_s2 + $0x28] sm:$0xff]  ;;  %v283_v60 = vld [vmem:[%s1197_s1 + $0x20] sm:$0xff]  ;;  %v103_v17 = vadd.s32 32, %v862_v19 }
   0xd   :  { %700 = vmatpush3.msra.mxu1 %v426_v29  ;;  %642 = vmatprep.subr.mxu0 %v791_v5  ;;  %v102_v56 = vadd.s32 32, %v50_v52  ;;  %v957_v57 = vsel %vm55_vm13, %v38_v48, 4  ;;  %v23_v62 = vld [vmem:[%s1196_s0 + $0x38] sm:$0xff]  ;;  %v418_v63 = vld [vmem:[%s1198_s2 + $0x20] sm:$0xff]  ;;  %v156_v3 = vadd.s32 64, %v50_v52  ;;  %v281_v7 = vld [vmem:[%s1197_s1 + $0x10] sm:$0xff] }
   0xe   :  { %701 = vmatprep.subr.mxu1 %v791_v5  ;;  %643 = vmatpush3.msra.mxu0 %v290_v30  ;;  %v105_v61 = vadd.s32 32, %v957_v57  ;;  %vm39_vm14 = vcmp.gt.s32.totalorder %v23_v62, 0  ;;  %v282_v1 = vld [vmem:[%s1197_s1 + $0x18] sm:$0xff]  ;;  %v24_v6 = vld [vmem:[%s1196_s0 + $0x40] sm:$0xff]  ;;  %v416_v8 = vld [vmem:[%s1198_s2 + $0x10] sm:$0xff]  ;;  %v210_v11 = vadd.s32 96, %v50_v52 }
   0xf   :  { %229 = vperm.xlu0 %765, %v211_v24   ;;  %762 = vset.pattern.permute.xlu1 %v793_v22  ;;  %v417_v2 = vld [vmem:[%s1198_s2 + $0x18] sm:$0xff]  ;;  %v40_v4 = vsel %vm39_vm14, %v23_v62, 0  ;;  %vm41_vm0 = vcmp.gt.s32.totalorder %v24_v6, 0  ;;  %v280_v9 = vld [vmem:[%s1197_s1 + $0x8] sm:$0xff]  ;;  %v279_v14 = vld [vmem:[%s1197_s1] sm:$0xff]  ;;  %vm795_vm2 = vmmov 0  }
  0x10   :  { %217 = vperm.xlu1 %762, %v207_v27   ;;  %702 = vmatpush3.msra.mxu1 %v425_v31  ;;  %vm57_vm15 = vcmp.lt.s32.totalorder %v40_v4, 4  ;;  %v415_v10 = vld [vmem:[%s1198_s2 + $0x8] sm:$0xff]  ;;  %v42_v13 = vsel %vm41_vm0, %v24_v6, 0  ;;  %v414_v15 = vld [vmem:[%s1198_s2] sm:$0xff]  ;;  %v157_v23 = vadd.s32 64, %v862_v19  ;;  %v104_v24 = vadd.s32 32, %v896_v34 }
  0x11   :  { %644 = vmatprep.subr.mxu0 %v791_v5  ;;  %703 = vmatprep.subr.mxu1 %v791_v5  ;;  %v58_v12 = vsel %vm57_vm15, %v40_v4, 4  ;;  %vm59_vm1 = vcmp.lt.s32.totalorder %v42_v13, 4  ;;  %v212_v25 = vadd.s32 96, %v896_v34  ;;  %v213_v26 = vadd.s32 96, %v957_v57 }
  0x12   :  { %645 = vmatpush3.msra.mxu0 %v289_v36  ;;  %704 = vmatpush3.msra.mxu1 %v424_v37  ;;  %v214_v16 = vadd.s32 96, %v58_v12  ;;  %v60_v18 = vsel %vm59_vm1, %v42_v13, 4  ;;  %v106_v27 = vadd.s32 32, %v58_v12 }
  0x13   :  { %773 = vset.pattern.permute.xlu0 %v792_v21  ;;  %646 = vmatprep.subr.mxu0 %v791_v5  ;;  %v161_v20 = vadd.s32 64, %v60_v18  ;;  %v107_v29 = vadd.s32 32, %v60_v18  ;;  %v215_v30 = vadd.s32 96, %v60_v18 }
  0x14   :  { %169 = vperm.xlu0 %773, %v155_v32   ;;  %763 = vset.pattern.permute.xlu1 %v792_v21 }
  0x15   :  { %166 = vperm.xlu1 %763, %v154_v33   ;;  %705 = vmatprep.subr.mxu1 %v791_v5 }
  0x16   :  { %647 = vmatpush3.msra.mxu0 %v288_v39  ;;  %706 = vmatpush3.msra.mxu1 %v423_v41 }
  0x17   :  { %648 = vmatprep.subr.mxu0 %v791_v5  ;;  %707 = vmatprep.subr.mxu1 %v791_v5 }
  0x18   :  { %178 = vperm.xlu0 %773, %v158_v38   ;;  %649 = vmatpush3.msra.mxu0 %v287_v43  ;;  %v61_v38 = vlaneseq  ;;  %v796_v43 = vmov 1.0  }
  0x19   :  { %764 = vset.pattern.permute.xlu1 %v790_v0  ;;  %708 = vmatpush3.msra.mxu1 %v422_v45 }
  0x1a   :  { %70 = vperm.xlu1 %764, %v880_v28   ;;  %650 = vmatprep.subr.mxu0 %v791_v5  ;;  %v160_v28 = vadd.s32 64, %v58_v12  ;;  %v1052_v39 = vand.u32 127, %v61_v38 }
  0x1b   :  { %709 = vmatprep.subr.mxu1 %v791_v5  ;;  %651 = vmatpush3.msra.mxu0 %v286_v49 }
  0x1c   :  { %776 = vset.pattern.permute.xlu0 %v794_v47  ;;  %710 = vmatpush3.msra.mxu1 %v421_v51 }
  0x1d   :  { %109 = vperm.xlu0 %776, %v99_v44   ;;  %652 = vmatprep.subr.mxu0 %v791_v5 }
  0x1e   :  { %766 = vset.pattern.permute.xlu1 %v794_v47  ;;  %711 = vmatprep.subr.mxu1 %v791_v5 }
  0x1f   :  { %115 = vperm.xlu1 %766, %v101_v46   ;;  %653 = vmatpush3.msra.mxu0 %v285_v53 }
  0x20   :  { %712 = vmatpush3.msra.mxu1 %v420_v54  ;;  %654 = vmatprep.subr.mxu0 %v791_v5 }
  0x21   :  { %112 = vperm.xlu0 %776, %v100_v50   ;;  %713 = vmatprep.subr.mxu1 %v791_v5 }
  0x22   :  { %655 = vmatpush3.msra.mxu0 %v284_v58  ;;  %714 = vmatpush3.msra.mxu1 %v419_v59 }
  0x23   :  { %767 = vset.pattern.permute.xlu1 %v793_v22  ;;  %656 = vmatprep.subr.mxu0 %v791_v5 }
  0x24   :  { %223 = vperm.xlu1 %767, %v209_v55   ;;  %715 = vmatprep.subr.mxu1 %v791_v5 }
  0x25   :  { %118 = vperm.xlu0 %776, %v102_v56   ;;  %657 = vmatpush3.msra.mxu0 %v283_v60 }
  0x26   :  { %716 = vmatpush3.msra.mxu1 %v418_v63  ;;  %658 = vmatprep.subr.mxu0 %v791_v5 }
  0x27   :  { %717 = vmatprep.subr.mxu1 %v791_v5  ;;  %659 = vmatpush3.msra.mxu0 %v282_v1 }
  0x28   :  { %768 = vset.pattern.permute.xlu1 %v790_v0  ;;  %718 = vmatpush3.msra.mxu1 %v417_v2 }
  0x29   :  { %73 = vperm.xlu1 %768, %v50_v52   ;;  %127 = vperm.xlu0 %776, %v105_v61  }
  0x2a   :  { %660 = vmatprep.subr.mxu0 %v791_v5  ;;  %719 = vmatprep.subr.mxu1 %v791_v5 }
  0x2b   :  { %661 = vmatpush3.msra.mxu0 %v281_v7  ;;  %720 = vmatpush3.msra.mxu1 %v416_v8 }
  0x2c   :  { %662 = vmatprep.subr.mxu0 %v791_v5  ;;  %721 = vmatprep.subr.mxu1 %v791_v5 }
  0x2d   :  { %769 = vset.pattern.permute.xlu1 %v792_v21  ;;  %779 = vset.pattern.permute.xlu0 %v790_v0 }
  0x2e   :  { %172 = vperm.xlu1 %769, %v156_v3   ;;  %76 = vperm.xlu0 %779, %v862_v19   ;;  %v159_v19 = vadd.s32 64, %v957_v57 }
  0x2f   :  { %663 = vmatpush3.msra.mxu0 %v280_v9  ;;  %722 = vmatpush3.msra.mxu1 %v415_v10 }
  0x30   :  { %664 = vmatprep.subr.mxu0 %v791_v5  ;;  %723 = vmatprep.subr.mxu1 %v791_v5 }
  0x31   :  { %665 = vmatpush3.msra.mxu0 %v279_v14  ;;  %666 = vmatprep.mubr.msk.f32.mxu0 %vm795_vm2, %v791_v5 }
  0x32   :  { %770 = vset.pattern.permute.xlu1 %v793_v22  ;;  %85 = vperm.xlu0 %779, %v58_v12  }
  0x33   :  { %226 = vperm.xlu1 %770, %v210_v11   ;;  %724 = vmatpush3.msra.mxu1 %v414_v15 }
  0x34   :  { %725 = vmatprep.mubr.msk.f32.mxu1 %vm795_vm2, %v791_v5 }
  0x36   :  { %784 = vset.pattern.permute.xlu0 %v793_v22 }
  0x37   :  { %771 = vset.pattern.permute.xlu1 %v794_v47  ;;  %238 = vperm.xlu0 %784, %v214_v16  }
  0x38   :  { %121 = vperm.xlu1 %771, %v103_v17  }
  0x3b   :  { %787 = vset.pattern.permute.xlu0 %v792_v21 }
  0x3c   :  { %772 = vset.pattern.permute.xlu1 %v792_v21  ;;  %187 = vperm.xlu0 %787, %v161_v20  }
  0x3d   :  { %175 = vperm.xlu1 %772, %v157_v23  }
  0x40   :  { %789 = vset.pattern.permute.xlu0 %v793_v22 }
  0x41   :  { %774 = vset.pattern.permute.xlu1 %v790_v0 }
  0x42   :  { %79 = vperm.xlu1 %774, %v896_v34  }
  0x46   :  { %775 = vset.pattern.permute.xlu1 %v794_v47 }
  0x47   :  { %124 = vperm.xlu1 %775, %v104_v24  }
  0x4b   :  { %777 = vset.pattern.permute.xlu1 %v793_v22 }
  0x4c   :  { %232 = vperm.xlu1 %777, %v212_v25  }
  0x50   :  { %778 = vset.pattern.permute.xlu1 %v790_v0 }
  0x51   :  { %82 = vperm.xlu1 %778, %v957_v57  }
  0x55   :  { %780 = vset.pattern.permute.xlu1 %v792_v21 }
  0x56   :  { %181 = vperm.xlu1 %780, %v159_v19  }
  0x5a   :  { %781 = vset.pattern.permute.xlu1 %v793_v22 }
  0x5b   :  { %235 = vperm.xlu1 %781, %v213_v26  }
  0x5f   :  { %782 = vset.pattern.permute.xlu1 %v794_v47 }
  0x60   :  { %130 = vperm.xlu1 %782, %v106_v27  }
  0x64   :  { %783 = vset.pattern.permute.xlu1 %v792_v21 }
  0x65   :  { %184 = vperm.xlu1 %783, %v160_v28  }
  0x69   :  { %785 = vset.pattern.permute.xlu1 %v790_v0 }
  0x6a   :  { %88 = vperm.xlu1 %785, %v60_v18  }
  0x6e   :  { %786 = vset.pattern.permute.xlu1 %v794_v47 }
  0x6f   :  { %133 = vperm.xlu1 %786, %v107_v29  }
  0x73   :  { %788 = vset.pattern.permute.xlu1 %v793_v22 }
  0x74   :  { %241 = vperm.xlu1 %788, %v215_v30  }
  0x81   :  { %v68_v31 = vpop.permute.xlu1 %67  ;;  %v65_v32 = vpop.permute.xlu0 %64 }
  0x82   :  { %vm90_vm3 = vcmp.eq.s32.totalorder %v1052_v39, %v65_v32  ;;  %vm91_vm9 = vcmp.eq.s32.totalorder %v1052_v39, %v68_v31 }
  0x86   :  { %v164_v33 = vpop.permute.xlu1 %163  ;;  %v221_v34 = vpop.permute.xlu0 %220 }
  0x87   :  { %vm189_vm5 = vcmp.eq.s32.totalorder %v1052_v39, %v164_v33  ;;  %vm244_vm15 = vcmp.eq.s32.totalorder %v1052_v39, %v221_v34 }
  0x8a   :  { %v1048_v35 = vpop.permute.xlu0 %229 }
  0x8b   :  { %v218_v36 = vpop.permute.xlu1 %217 }
  0x8c   :  { %vm243_vm8 = vcmp.eq.s32.totalorder %v1052_v39, %v218_v36 }
  0x8f   :  { %v170_v21 = vpop.permute.xlu0 %169 }
  0x90   :  { %v167_v37 = vpop.permute.xlu1 %166 }
  0x91   :  { %vm190_vm12 = vcmp.eq.s32.totalorder %v1052_v39, %v167_v37 }
  0x93   :  { %v1050_v0 = vpop.permute.xlu0 %178 }
  0x95   :  { %v71_v40 = vpop.permute.xlu1 %70 }
  0x96   :  { %vm92_vm1 = vcmp.eq.s32.totalorder %v1052_v39, %v71_v40 }
  0x98   :  { %v110_v41 = vpop.permute.xlu0 %109 }
  0x99   :  { %vm135_vm4 = vcmp.eq.s32.totalorder %v1052_v39, %v110_v41 }
  0x9a   :  { %vm144_vm6 = vmor %vm90_vm3, %vm135_vm4  ;;  %v116_v22 = vpop.permute.xlu1 %115  ;;  %vm191_vm4 = vcmp.eq.s32.totalorder %v1052_v39, %v170_v21 }
  0x9b   :  { %vm198_vm7 = vmor %vm144_vm6, %vm189_vm5  ;;  %vm137_vm13 = vcmp.eq.s32.totalorder %v1052_v39, %v116_v22 }
  0x9c   :  { %v113_v42 = vpop.permute.xlu0 %112  ;;  %vm252_vm11 = vmor %vm198_vm7, %vm243_vm8 }
  0x9d   :  { %vm136_vm10 = vcmp.eq.s32.totalorder %v1052_v39, %v113_v42  ;;  %667 = vmatmul.mubr.msk.f32.vlgmr.msra.gmra.mxu0 %vm252_vm11, %v796_v43  ;;  %726 = vmatmul.mubr.msk.f32.vlgmr.msra.gmra.mxu1 %vm252_vm11, %v796_v43  ;;  %vm146_vm3 = vmor %vm92_vm1, %vm137_vm13 }
  0x9e   :  { %vm145_vm14 = vmor %vm91_vm9, %vm136_vm10  ;;  %669 = vmatprep.mubr.msk.f32.mxu0 %vm795_vm2, %v791_v5  ;;  %728 = vmatprep.mubr.msk.f32.mxu1 %vm795_vm2, %v791_v5 }
  0x9f   :  { %vm199_vm0 = vmor %vm145_vm14, %vm190_vm12  ;;  %v224_v44 = vpop.permute.xlu1 %223 }
  0xa0   :  { %vm253_vm5 = vmor %vm199_vm0, %vm244_vm15  ;;  %vm245_vm6 = vcmp.eq.s32.totalorder %v1052_v39, %v224_v44  ;;  %v119_v46 = vpop.permute.xlu0 %118 }
  0xa1   :  { %670 = vmatmul.mubr.msk.f32.gmra.mxu0 %vm253_vm5, %v796_v43  ;;  %729 = vmatmul.mubr.msk.f32.gmra.mxu1 %vm253_vm5, %v796_v43  ;;  %vm200_vm7 = vmor %vm146_vm3, %vm191_vm4  ;;  %vm138_vm10 = vcmp.eq.s32.totalorder %v1052_v39, %v119_v46  ;;  %vm247_vm3 = vcmp.eq.s32.totalorder %v1052_v39, %v1048_v35 }
  0xa2   :  { %672 = vmatprep.mubr.msk.f32.mxu0 %vm795_vm2, %v791_v5  ;;  %731 = vmatprep.mubr.msk.f32.mxu1 %vm795_vm2, %v791_v5  ;;  %vm254_vm8 = vmor %vm200_vm7, %vm245_vm6 }
  0xa4   :  { %v74_v45 = vpop.permute.xlu1 %73  ;;  %v128_v48 = vpop.permute.xlu0 %127 }
  0xa5   :  { %673 = vmatmul.mubr.msk.f32.gmra.mxu0 %vm254_vm8, %v796_v43  ;;  %732 = vmatmul.mubr.msk.f32.gmra.mxu1 %vm254_vm8, %v796_v43  ;;  %vm93_vm9 = vcmp.eq.s32.totalorder %v1052_v39, %v74_v45 }
  0xa6   :  { %675 = vmatprep.mubr.msk.f32.mxu0 %vm795_vm2, %v791_v5  ;;  %734 = vmatprep.mubr.msk.f32.mxu1 %vm795_vm2, %v791_v5  ;;  %vm147_vm12 = vmor %vm93_vm9, %vm138_vm10  ;;  %vm194_vm10 = vcmp.eq.s32.totalorder %v1052_v39, %v1050_v0 }
  0xa9   :  { %v173_v47 = vpop.permute.xlu1 %172  ;;  %v77_v51 = vpop.permute.xlu0 %76 }
  0xaa   :  { %vm192_vm11 = vcmp.eq.s32.totalorder %v1052_v39, %v173_v47  ;;  %vm94_vm1 = vcmp.eq.s32.totalorder %v1052_v39, %v77_v51 }
  0xab   :  { %vm201_vm13 = vmor %vm147_vm12, %vm192_vm11 }
  0xad   :  { %v86_v59 = vpop.permute.xlu0 %85 }
  0xae   :  { %v227_v49 = vpop.permute.xlu1 %226 }
  0xaf   :  { %vm246_vm14 = vcmp.eq.s32.totalorder %v1052_v39, %v227_v49 }
  0xb0   :  { %vm255_vm15 = vmor %vm201_vm13, %vm246_vm14 }
  0xb1   :  { %676 = vmatmul.mubr.msk.f32.gmra.mxu0 %vm255_vm15, %v796_v43  ;;  %735 = vmatmul.mubr.msk.f32.gmra.mxu1 %vm255_vm15, %v796_v43  ;;  %vm141_vm15 = vcmp.eq.s32.totalorder %v1052_v39, %v128_v48 }
  0xb2   :  { %678 = vmatprep.mubr.msk.f32.mxu0 %vm795_vm2, %v791_v5  ;;  %737 = vmatprep.mubr.msk.f32.mxu1 %vm795_vm2, %v791_v5  ;;  %v239_v61 = vpop.permute.xlu0 %238 }
  0xb3   :  { %v122_v50 = vpop.permute.xlu1 %121 }
  0xb4   :  { %vm139_vm0 = vcmp.eq.s32.totalorder %v1052_v39, %v122_v50 }
  0xb5   :  { %vm148_vm4 = vmor %vm94_vm1, %vm139_vm0 }
  0xb7   :  { %v188_v2 = vpop.permute.xlu0 %187 }
  0xb8   :  { %v176_v52 = vpop.permute.xlu1 %175 }
  0xb9   :  { %vm193_vm5 = vcmp.eq.s32.totalorder %v1052_v39, %v176_v52 }
  0xba   :  { %vm202_vm6 = vmor %vm148_vm4, %vm193_vm5 }
  0xbb   :  { %vm256_vm7 = vmor %vm202_vm6, %vm247_vm3 }
  0xbc   :  { %679 = vmatmul.mubr.msk.f32.gmra.mxu0 %vm256_vm7, %v796_v43  ;;  %738 = vmatmul.mubr.msk.f32.gmra.mxu1 %vm256_vm7, %v796_v43 }
  0xbd   :  { %v80_v53 = vpop.permute.xlu1 %79  ;;  %681 = vmatprep.mubr.msk.f32.mxu0 %vm795_vm2, %v791_v5  ;;  %740 = vmatprep.mubr.msk.f32.mxu1 %vm795_vm2, %v791_v5 }
  0xbe   :  { %vm95_vm9 = vcmp.eq.s32.totalorder %v1052_v39, %v80_v53 }
  0xc2   :  { %v125_v54 = vpop.permute.xlu1 %124 }
  0xc3   :  { %vm140_vm8 = vcmp.eq.s32.totalorder %v1052_v39, %v125_v54 }
  0xc4   :  { %vm149_vm11 = vmor %vm95_vm9, %vm140_vm8  ;;  %vm97_vm8 = vcmp.eq.s32.totalorder %v1052_v39, %v86_v59  ;;  %vm250_vm9 = vcmp.eq.s32.totalorder %v1052_v39, %v239_v61 }
  0xc5   :  { %vm203_vm12 = vmor %vm149_vm11, %vm194_vm10 }
  0xc7   :  { %v233_v55 = vpop.permute.xlu1 %232 }
  0xc8   :  { %vm248_vm13 = vcmp.eq.s32.totalorder %v1052_v39, %v233_v55 }
  0xc9   :  { %vm257_vm14 = vmor %vm203_vm12, %vm248_vm13 }
  0xca   :  { %682 = vmatmul.mubr.msk.f32.gmra.mxu0 %vm257_vm14, %v796_v43  ;;  %741 = vmatmul.mubr.msk.f32.gmra.mxu1 %vm257_vm14, %v796_v43 }
  0xcb   :  { %684 = vmatprep.mubr.msk.f32.mxu0 %vm795_vm2, %v791_v5  ;;  %743 = vmatprep.mubr.msk.f32.mxu1 %vm795_vm2, %v791_v5 }
  0xcc   :  { %v83_v56 = vpop.permute.xlu1 %82 }
  0xcd   :  { %vm96_vm0 = vcmp.eq.s32.totalorder %v1052_v39, %v83_v56 }
  0xce   :  { %vm150_vm3 = vmor %vm96_vm0, %vm141_vm15 }
  0xd1   :  { %v182_v57 = vpop.permute.xlu1 %181 }
  0xd2   :  { %vm195_vm1 = vcmp.eq.s32.totalorder %v1052_v39, %v182_v57 }
  0xd3   :  { %vm204_vm4 = vmor %vm150_vm3, %vm195_vm1  ;;  %vm197_vm1 = vcmp.eq.s32.totalorder %v1052_v39, %v188_v2 }
  0xd6   :  { %v236_v58 = vpop.permute.xlu1 %235 }
  0xd7   :  { %vm249_vm5 = vcmp.eq.s32.totalorder %v1052_v39, %v236_v58 }
  0xd8   :  { %vm258_vm6 = vmor %vm204_vm4, %vm249_vm5 }
  0xd9   :  { %685 = vmatmul.mubr.msk.f32.gmra.mxu0 %vm258_vm6, %v796_v43  ;;  %744 = vmatmul.mubr.msk.f32.gmra.mxu1 %vm258_vm6, %v796_v43 }
  0xda   :  { %687 = vmatprep.mubr.msk.f32.mxu0 %vm795_vm2, %v791_v5  ;;  %746 = vmatprep.mubr.msk.f32.mxu1 %vm795_vm2, %v791_v5 }
  0xdb   :  { %v131_v60 = vpop.permute.xlu1 %130 }
  0xdc   :  { %vm142_vm7 = vcmp.eq.s32.totalorder %v1052_v39, %v131_v60 }
  0xdd   :  { %vm151_vm10 = vmor %vm97_vm8, %vm142_vm7 }
  0xe0   :  { %v185_v62 = vpop.permute.xlu1 %184 }
  0xe1   :  { %vm196_vm11 = vcmp.eq.s32.totalorder %v1052_v39, %v185_v62 }
  0xe2   :  { %vm205_vm12 = vmor %vm151_vm10, %vm196_vm11 }
  0xe3   :  { %vm259_vm13 = vmor %vm205_vm12, %vm250_vm9 }
  0xe4   :  { %688 = vmatmul.mubr.msk.f32.gmra.mxu0 %vm259_vm13, %v796_v43  ;;  %747 = vmatmul.mubr.msk.f32.gmra.mxu1 %vm259_vm13, %v796_v43 }
  0xe5   :  { %v89_v63 = vpop.permute.xlu1 %88  ;;  %690 = vmatprep.mubr.msk.f32.mxu0 %vm795_vm2, %v791_v5  ;;  %749 = vmatprep.mubr.msk.f32.mxu1 %vm795_vm2, %v791_v5 }
  0xe6   :  { %vm98_vm15 = vcmp.eq.s32.totalorder %v1052_v39, %v89_v63 }
  0xea   :  { %v134_v1 = vpop.permute.xlu1 %133 }
  0xeb   :  { %vm143_vm14 = vcmp.eq.s32.totalorder %v1052_v39, %v134_v1 }
  0xec   :  { %vm152_vm0 = vmor %vm98_vm15, %vm143_vm14 }
  0xed   :  { %vm206_vm3 = vmor %vm152_vm0, %vm197_vm1 }
  0xef   :  { %v242_v3 = vpop.permute.xlu1 %241 }
  0xf0   :  { %vm251_vm4 = vcmp.eq.s32.totalorder %v1052_v39, %v242_v3 }
  0xf1   :  { %vm260_vm5 = vmor %vm206_vm3, %vm251_vm4 }
  0xf2   :  { %691 = vmatmul.mubr.msk.f32.gmra.mxu0 %vm260_vm5, %v796_v43  ;;  %750 = vmatmul.mubr.msk.f32.gmra.mxu1 %vm260_vm5, %v796_v43 }
 0x15d   :  { %v361_v4 = vpop.f32.mrf.mxu0  ;;  %v496_v5 = vpop.f32.mrf.mxu1 }
 0x15e   :  { %405 = vst [vmem:[%s1199_s3] sm:$0xff] %v361_v4  ;;  %540 = vst [vmem:[%s1200_s4] sm:$0xff] %v496_v5 }
 0x15f   :  { %v668_v6 = vpop.f32.mrf.mxu0  ;;  %v727_v7 = vpop.f32.mrf.mxu1 }
 0x161   :  { %v366_v8 = vpop.f32.mrf.mxu0  ;;  %v501_v9 = vpop.f32.mrf.mxu1 }
 0x162   :  { %406 = vst [vmem:[%s1199_s3 + $0x8] sm:$0xff] %v366_v8  ;;  %541 = vst [vmem:[%s1200_s4 + $0x8] sm:$0xff] %v501_v9 }
 0x163   :  { %v671_v10 = vpop.f32.mrf.mxu0  ;;  %v730_v11 = vpop.f32.mrf.mxu1 }
 0x165   :  { %v371_v12 = vpop.f32.mrf.mxu0  ;;  %v506_v13 = vpop.f32.mrf.mxu1 }
 0x166   :  { %407 = vst [vmem:[%s1199_s3 + $0x10] sm:$0xff] %v371_v12  ;;  %542 = vst [vmem:[%s1200_s4 + $0x10] sm:$0xff] %v506_v13 }
 0x167   :  { %v674_v14 = vpop.f32.mrf.mxu0  ;;  %v733_v15 = vpop.f32.mrf.mxu1 }
 0x171   :  { %v376_v16 = vpop.f32.mrf.mxu0  ;;  %v511_v17 = vpop.f32.mrf.mxu1 }
 0x172   :  { %408 = vst [vmem:[%s1199_s3 + $0x18] sm:$0xff] %v376_v16  ;;  %543 = vst [vmem:[%s1200_s4 + $0x18] sm:$0xff] %v511_v17 }
 0x173   :  { %v677_v18 = vpop.f32.mrf.mxu0  ;;  %v736_v20 = vpop.f32.mrf.mxu1 }
 0x17c   :  { %v381_v23 = vpop.f32.mrf.mxu0  ;;  %v516_v24 = vpop.f32.mrf.mxu1 }
 0x17d   :  { %409 = vst [vmem:[%s1199_s3 + $0x20] sm:$0xff] %v381_v23  ;;  %544 = vst [vmem:[%s1200_s4 + $0x20] sm:$0xff] %v516_v24 }
 0x17e   :  { %v680_v25 = vpop.f32.mrf.mxu0  ;;  %v739_v19 = vpop.f32.mrf.mxu1 }
 0x18a   :  { %v386_v26 = vpop.f32.mrf.mxu0  ;;  %v521_v27 = vpop.f32.mrf.mxu1 }
 0x18b   :  { %410 = vst [vmem:[%s1199_s3 + $0x28] sm:$0xff] %v386_v26  ;;  %545 = vst [vmem:[%s1200_s4 + $0x28] sm:$0xff] %v521_v27 }
 0x18c   :  { %v683_v28 = vpop.f32.mrf.mxu0  ;;  %v742_v29 = vpop.f32.mrf.mxu1 }
 0x199   :  { %v391_v30 = vpop.f32.mrf.mxu0  ;;  %v526_v31 = vpop.f32.mrf.mxu1 }
 0x19a   :  { %411 = vst [vmem:[%s1199_s3 + $0x30] sm:$0xff] %v391_v30  ;;  %546 = vst [vmem:[%s1200_s4 + $0x30] sm:$0xff] %v526_v31 }
 0x19b   :  { %v686_v32 = vpop.f32.mrf.mxu0  ;;  %v745_v33 = vpop.f32.mrf.mxu1 }
 0x1a4   :  { %v396_v34 = vpop.f32.mrf.mxu0  ;;  %v531_v35 = vpop.f32.mrf.mxu1 }
 0x1a5   :  { %412 = vst [vmem:[%s1199_s3 + $0x38] sm:$0xff] %v396_v34  ;;  %547 = vst [vmem:[%s1200_s4 + $0x38] sm:$0xff] %v531_v35 }
 0x1a6   :  { %v689_v36 = vpop.f32.mrf.mxu0  ;;  %v748_v21 = vpop.f32.mrf.mxu1 }
 0x1b2   :  { %v401_v37 = vpop.f32.mrf.mxu0  ;;  %v536_v38 = vpop.f32.mrf.mxu1 }
 0x1b3   :  { %413 = vst [vmem:[%s1199_s3 + $0x40] sm:$0xff] %v401_v37  ;;  %548 = vst [vmem:[%s1200_s4 + $0x40] sm:$0xff] %v536_v38 }
 0x1b4   :  { %v692_v0 = vpop.f32.mrf.mxu0  ;;  %v751_v39 = vpop.f32.mrf.mxu1 }

</bundles_post_ra>
